<compile_context>
chip_gen: v7x
topology: tpu7x:2x2x1
jax: 0.10.0
libtpu: 0.0.40
codegen_flags: <defaults>
</compile_context>

<pallas_src>
import functools

import jax
import jax.numpy as jnp
from jax import lax
from jax.experimental import pallas as pl
from jax.experimental.pallas import tpu as pltpu


def _round_up(x: int, m: int) -> int:
    return ((x + m - 1) // m) * m


def _dense_kernel(x_ref, w_ref, b_ref, o_ref, acc_ref, *, act: str,
                  k_rem: int, compute_dtype):
    # x_ref: (tm, tk)  w_ref: (tk, tn)  b_ref: (1, tn)  o_ref: (tm, tn)
    k = pl.program_id(2)
    n_k = pl.num_programs(2)

    @pl.when(k == 0)
    def _():
        acc_ref[...] = jnp.zeros_like(acc_ref)

    x = x_ref[...]
    w = w_ref[...]

    if k_rem:
        # K does not divide tk (static): zero the unspecified tail of the last
        # K block for BOTH operands (exact zeros, so no NaN/Inf can leak into
        # the reduction from the partial edge block).
        tk_blk = x.shape[1]
        limit = jnp.where(k == n_k - 1, k_rem, tk_blk)
        x_mask = lax.broadcasted_iota(jnp.int32, x.shape, 1) < limit
        w_mask = lax.broadcasted_iota(jnp.int32, w.shape, 0) < limit
        x = jnp.where(x_mask, x, 0)
        w = jnp.where(w_mask, w, 0)

    if compute_dtype is not None:
        x = x.astype(compute_dtype)
        w = w.astype(compute_dtype)

    # Plain (tm, tk) @ (tk, tn) -> MXU, f32 accumulate.
    acc_ref[...] += jnp.dot(x, w, preferred_element_type=jnp.float32)

    @pl.when(k == n_k - 1)
    def _():
        out = acc_ref[...] + b_ref[...].astype(jnp.float32)
        if act == "gelu":
            # exact erf form, matching PyTorch nn.GELU default
            out = jax.nn.gelu(out, approximate=False)
        elif act == "gelu_tanh":
            # tanh approximation -> EUP slot (cheaper epilogue)
            out = jax.nn.gelu(out, approximate=True)
        elif act == "relu":
            out = jnp.maximum(out, 0.0)
        # act == "identity": nn.Identity -> no-op
        o_ref[...] = out.astype(o_ref.dtype)


def dense(x, weight, bias, act: str = "identity",
          tm: int = 512, tn: int = 512, tk: int = 512,
          compute_dtype=None):
    """y = act(x @ weight.T + bias); weight: (out_features, in_features).

    Per-generation tuning notes: tk=1024 (f32) is fine on v6e (128 MiB VMEM);
    keep tk<=512 f32 (or 1024 bf16) on v7x (64 MiB VMEM per TensorCore).
    """
    orig_shape = x.shape
    k_dim = orig_shape[-1]
    n_dim = weight.shape[0]

    # Flatten leading dims into M (glue, not the hot path).
    x2d = x.reshape(-1, k_dim)
    m_dim = x2d.shape[0]

    # Stage the weight as (K, N) so the kernel contracts K without an
    # in-kernel transpose.  In a real model, store the weight pre-transposed
    # so this copy happens once at init, not per call.
    w_t = weight.T                      # (K, N)
    b2d = bias.reshape(1, n_dim)

    # Tile sizes: lane dims (tk, tn) multiples of 128, sublane (tm) of 8.
    tm = min(tm, _round_up(m_dim, 8))
    tn = min(tn, _round_up(n_dim, 128))
    tk = min(tk, _round_up(k_dim, 128))

    grid_m = pl.cdiv(m_dim, tm)
    # v7x megacore: if M yields a single parallel block, make sure N splits
    # into >= 2 blocks so both TensorCores get work.
    if grid_m == 1 and n_dim > 128 and pl.cdiv(n_dim, tn) < 2:
        tn = _round_up(pl.cdiv(n_dim, 2), 128)
    grid_n = pl.cdiv(n_dim, tn)
    grid_k = pl.cdiv(k_dim, tk)
    grid = (grid_m, grid_n, grid_k)

    k_rem = k_dim % tk  # static; if nonzero, kernel masks the last K block

    # Skinny-M (decode-style) calls are weight-streaming: deepen weight
    # buffering to hide the HBM latency of the (tk, tn) weight DMA.
    deep_w = (grid_m == 1) and (grid_n * grid_k >= 3)
    if deep_w:
        w_spec = pl.BlockSpec((tk, tn), lambda i, j, k: (k, j),
                              pipeline_mode=pl.Buffered(3))
    else:
        w_spec = pl.BlockSpec((tk, tn), lambda i, j, k: (k, j))

    out_dtype = x.dtype

    # VMEM budget for this tile config (double/triple buffered) + headroom.
    buf_bytes = (
        2 * tm * tk * x2d.dtype.itemsize
        + (3 if deep_w else 2) * tk * tn * w_t.dtype.itemsize
        + 2 * tn * b2d.dtype.itemsize
        + 2 * tm * tn * jnp.dtype(out_dtype).itemsize
        + tm * tn * 4  # f32 accumulator scratch
    )
    vmem_limit = max(32 << 20, int(1.5 * buf_bytes))

    flops = 2 * m_dim * n_dim * k_dim
    bytes_accessed = (
        x2d.size * x2d.dtype.itemsize
        + w_t.size * w_t.dtype.itemsize
        + b2d.size * b2d.dtype.itemsize
        + m_dim * n_dim * jnp.dtype(out_dtype).itemsize
    )
    transcendentals = m_dim * n_dim if act in ("gelu", "gelu_tanh") else 0

    out = pl.pallas_call(
        functools.partial(_dense_kernel, act=act, k_rem=k_rem,
                          compute_dtype=compute_dtype),
        out_shape=jax.ShapeDtypeStruct((m_dim, n_dim), out_dtype),
        grid_spec=pltpu.PrefetchScalarGridSpec(
            num_scalar_prefetch=0,
            grid=grid,
            in_specs=[
                pl.BlockSpec((tm, tk), lambda i, j, k: (i, k)),   # x
                w_spec,                                           # weight (K, N)
                pl.BlockSpec((1, tn), lambda i, j, k: (0, j)),    # bias
            ],
            out_specs=pl.BlockSpec((tm, tn), lambda i, j, k: (i, j)),
            scratch_shapes=[pltpu.VMEM((tm, tn), jnp.float32)],
        ),
        compiler_params=pltpu.CompilerParams(
            dimension_semantics=("parallel", "parallel", "arbitrary"),
            vmem_limit_bytes=vmem_limit,
        ),
        cost_estimate=pl.CostEstimate(
            flops=flops,
            transcendentals=transcendentals,
            bytes_accessed=bytes_accessed,
        ),
    )(x2d, w_t, b2d)

    return out.reshape(*orig_shape[:-1], n_dim)


if __name__ == "__main__":
    key = jax.random.PRNGKey(0)
    k_x, k_w, k_b = jax.random.split(key, 3)

    batch, seq, in_features, out_features = 2, 8, 32, 32

    # Deterministic param init mirroring nn.Linear defaults:
    # U(-1/sqrt(in_features), 1/sqrt(in_features))
    bound = 1.0 / (in_features ** 0.5)
    weight = jax.random.uniform(
        k_w, (out_features, in_features), jnp.float32, -bound, bound
    )
    bias = jax.random.uniform(
        k_b, (out_features,), jnp.float32, -bound, bound
    )

    x = jax.random.normal(k_x, (batch, seq, in_features), jnp.float32)

    # Default module config: act_layer=None -> nn.Identity.
    y = dense(x, weight, bias, act="identity")
    jax.block_until_ready(y)

    y_ref = x @ weight.T + bias
    assert y.shape == (batch, seq, out_features)
    assert jnp.allclose(y, y_ref, atol=1e-5, rtol=1e-5)

    # Also exercise an activation head (act_layer=nn.ReLU case).
    y_relu = dense(x, weight, bias, act="relu")
    jax.block_until_ready(y_relu)
    assert jnp.allclose(y_relu, jnp.maximum(y_ref, 0.0), atol=1e-5, rtol=1e-5)

    print("KERNEL_OK")
</pallas_src>

<mosaic_0001>
module attributes {stable_mosaic.version = 11 : i64} {
  func.func @_dense_kernel(%arg0: i32, %arg1: i32, %arg2: i32, %arg3: memref<16x128xf32, #tpu.memory_space<vmem>>, %arg4: memref<128x128xf32, #tpu.memory_space<vmem>>, %arg5: memref<1x128xf32, #tpu.memory_space<vmem>>, %arg6: memref<16x128xf32, #tpu.memory_space<vmem>>, %arg7: memref<16x128xf32, #tpu.memory_space<vmem>>) attributes {dimension_semantics = [#tpu.dimension_semantics<parallel>, #tpu.dimension_semantics<parallel>, #tpu.dimension_semantics<arbitrary>], iteration_bounds = array<i64: 1, 1, 1>, scalar_prefetch = 0 : i64, scratch_operands = 1 : i64, tpu.core_type = #tpu.core_type<tc>, window_params = [{transform_indices = @transform_0, window_bounds = array<i64: 16, 128>}, {transform_indices = @transform_1, window_bounds = array<i64: 128, 128>}, {transform_indices = @transform_2, window_bounds = array<i64: 1, 128>}, {transform_indices = @transform_3, window_bounds = array<i64: 16, 128>}]} {
    %c0_i32 = arith.constant 0 : i32
    %0 = arith.cmpi eq, %arg2, %c0_i32 : i32
    %1 = arith.extui %0 : i1 to i32
    %c0_i32_0 = arith.constant 0 : i32
    %2 = arith.cmpi ne, %1, %c0_i32_0 : i32
    scf.if %2 {
      %cst_13 = arith.constant 0.000000e+00 : f32
      %26 = vector.broadcast %cst_13 : f32 to vector<16x128xf32>
      %c0_14 = arith.constant 0 : index
      %c0_15 = arith.constant 0 : index
      %27 = vector.load %arg7[%c0_14, %c0_15] : memref<16x128xf32, #tpu.memory_space<vmem>>, vector<16x128xf32>
      tpu.vector_store %arg7[%c0_14, %c0_15], %26 {strides = array<i32>} : memref<16x128xf32, #tpu.memory_space<vmem>>, vector<16x128xf32>,
    } else {
    }
    %c0 = arith.constant 0 : index
    %c0_1 = arith.constant 0 : index
    %3 = vector.load %arg3[%c0, %c0_1] : memref<16x128xf32, #tpu.memory_space<vmem>>, vector<16x128xf32>
    %c0_2 = arith.constant 0 : index
    %c0_3 = arith.constant 0 : index
    %4 = vector.load %arg4[%c0_2, %c0_3] : memref<128x128xf32, #tpu.memory_space<vmem>>, vector<128x128xf32>
    %c0_i32_4 = arith.constant 0 : i32
    %5 = arith.cmpi eq, %arg2, %c0_i32_4 : i32
    %c32_i32 = arith.constant 32 : i32
    %c128_i32 = arith.constant 128 : i32
    %6 = arith.select %5, %c32_i32, %c128_i32 : i32
    %7 = tpu.iota {dimensions = array<i32: 1>} : vector<16x128xi32>
    %8 = vector.broadcast %6 : i32 to vector<16x128xi32>
    %9 = arith.cmpi slt, %7, %8 : vector<16x128xi32>
    %10 = tpu.iota {dimensions = array<i32: 0>} : vector<128x128xi32>
    %11 = vector.broadcast %6 : i32 to vector<128x128xi32>
    %12 = arith.cmpi slt, %10, %11 : vector<128x128xi32>
    %c0_i32_5 = arith.constant 0 : i32
    %13 = arith.sitofp %c0_i32_5 : i32 to f32
    %14 = vector.broadcast %13 : f32 to vector<16x128xf32>
    %15 = arith.select %9, %3, %14 : vector<16x128xi1>, vector<16x128xf32>
    %c0_i32_6 = arith.constant 0 : i32
    %16 = arith.sitofp %c0_i32_6 : i32 to f32
    %17 = vector.broadcast %16 : f32 to vector<128x128xf32>
    %18 = arith.select %12, %4, %17 : vector<128x128xi1>, vector<128x128xf32>
    %c0_7 = arith.constant 0 : index
    %c0_8 = arith.constant 0 : index
    %19 = vector.load %arg7[%c0_7, %c0_8] : memref<16x128xf32, #tpu.memory_space<vmem>>, vector<16x128xf32>
    %cst = arith.constant dense<0.000000e+00> : vector<16x128xf32>
    %20 = tpu.matmul %15, %18, %cst {dimension_numbers = #tpu.dot_dimension_numbers<[1], [0], [0], [1], [0, 0, 1, 1], [], []>} : vector<16x128xf32>, vector<128x128xf32>, vector<16x128xf32> -> vector<16x128xf32>
    %21 = arith.addf %19, %20 : vector<16x128xf32>
    %c0_9 = arith.constant 0 : index
    %c0_10 = arith.constant 0 : index
    %22 = vector.load %arg7[%c0_9, %c0_10] : memref<16x128xf32, #tpu.memory_space<vmem>>, vector<16x128xf32>
    tpu.vector_store %arg7[%c0_9, %c0_10], %21 {strides = array<i32>} : memref<16x128xf32, #tpu.memory_space<vmem>>, vector<16x128xf32>,
    %c0_i32_11 = arith.constant 0 : i32
    %23 = arith.cmpi eq, %arg2, %c0_i32_11 : i32
    %24 = arith.extui %23 : i1 to i32
    %c0_i32_12 = arith.constant 0 : i32
    %25 = arith.cmpi ne, %24, %c0_i32_12 : i32
    scf.if %25 {
      %c0_13 = arith.constant 0 : index
      %c0_14 = arith.constant 0 : index
      %26 = vector.load %arg7[%c0_13, %c0_14] : memref<16x128xf32, #tpu.memory_space<vmem>>, vector<16x128xf32>
      %c0_15 = arith.constant 0 : index
      %c0_16 = arith.constant 0 : index
      %27 = vector.load %arg5[%c0_15, %c0_16] : memref<1x128xf32, #tpu.memory_space<vmem>>, vector<1x128xf32>
      %28 = vector.broadcast %27 : vector<1x128xf32> to vector<16x128xf32>
      %29 = arith.addf %26, %28 : vector<16x128xf32>
      %c0_17 = arith.constant 0 : index
      %c0_18 = arith.constant 0 : index
      %30 = vector.load %arg6[%c0_17, %c0_18] : memref<16x128xf32, #tpu.memory_space<vmem>>, vector<16x128xf32>
      tpu.vector_store %arg6[%c0_17, %c0_18], %29 {strides = array<i32>} : memref<16x128xf32, #tpu.memory_space<vmem>>, vector<16x128xf32>,
    } else {
    }
    return
  }
  func.func @transform_0(%arg0: i32, %arg1: i32, %arg2: i32) -> (i32, i32) {
    %c0_i32 = arith.constant 0 : i32
    return %arg0, %arg2 : i32, i32
  }
  func.func @transform_1(%arg0: i32, %arg1: i32, %arg2: i32) -> (i32, i32) {
    %c0_i32 = arith.constant 0 : i32
    return %arg2, %arg1 : i32, i32
  }
  func.func @transform_2(%arg0: i32, %arg1: i32, %arg2: i32) -> (i32, i32) {
    %c0_i32 = arith.constant 0 : i32
    %c0_i32_0 = arith.constant 0 : i32
    return %c0_i32, %arg1 : i32, i32
  }
  func.func @transform_3(%arg0: i32, %arg1: i32, %arg2: i32) -> (i32, i32) {
    %c0_i32 = arith.constant 0 : i32
    return %arg0, %arg1 : i32, i32
  }
}

</mosaic_0001>

<bundles_post_ra>
// kernel: tpu_custom_call.1
= control target key start
LH: loop header
LB: loop body
LE: loop exit
PB: predicated region body
PF: predicated region fallthrough
CT: control target
= control target key end

     0   :  { %8 = vsyncpa [#allocation4], 0  ;;  %s416_s0 = inlined_call_operand.hbm [shape: f32[16,32], index: 0, kind: input, shape index: {}]   ;;  %s417_s1 = inlined_call_operand.hbm [shape: f32[32,32], index: 1, kind: input, shape index: {}]   ;;  %s418_s2 = inlined_call_operand.vmem [shape: f32[1,32], index: 2, kind: input, shape index: {}]   ;;  %s419_s3 = inlined_call_operand.hbm [shape: f32[16,32], index: 3, kind: output, shape index: {}]  }
   0x1   :  { %9 = vsyncpa [#allocation7], 0 }
   0x2   :  { %10 = vsyncpa [#allocation5], 0  ;;  %s343_s12 = smov [#allocation3]   ;;  %s271_s16 = scalar_lea.hbm %s416_s0, 256 }
   0x3   :  { %s16_s13 = sshll.u32 %s343_s12, 4  ;;  %p272_p0 = scmp.ne.s32.totalorder %s416_s0, %s271_s16  ;;  %s17_s13 = int_to_ptr.vmem [resolvable:$true] %s16_s13 }
   0x4   :  { %p275_p1 = scmp.lt.u32.totalorder %s271_s16, %s416_s0 }
   0x6   :  { %p277_p2 = pnand %p275_p1, %p272_p0 }
   0x8   :  { %280 = shalt.err (!%p277_p2)
}
   0x9   :  { %s281_s21 = scalar_lea.vmem %s17_s13, 256  ;;  %p286_p4 = scmp.lt.s32.totalorder %s17_s13, %s17_s13 }
   0xa   :  { %p282_p3 = scmp.ne.s32.totalorder %s17_s13, %s281_s21  ;;  %p287_p5 = scmp.lt.s32.totalorder %s281_s21, %s281_s21 }
   0xc   :  { %p288_p6 = por %p287_p5, %p286_p4 }
   0xe   :  { %p289_p7 = pnand %p288_p6, %p282_p3 }
  0x10   :  { %292 = shalt.err (!%p289_p7)
}
  0x11   :  { %s344_s22 = smov 128   ;;  %s345_s23 = smov 8  }
  0x12   :  { %22 = dma.hbm_to_vmem [thread:$0]  %s416_s0, 256, %s17_s13, [#allocation4], %s344_s22, %s344_s22, %s345_s23  }
  0x13   :  { %27 = vsyncadd [#allocation7], 1536  ;;  %s346_s26 = smov [#allocation6]   ;;  %s293_s30 = scalar_lea.hbm %s417_s1, 512 }
  0x14   :  { %s28_s27 = sshll.u32 %s346_s26, 4  ;;  %p294_p8 = scmp.ne.s32.totalorder %s417_s1, %s293_s30  ;;  %s29_s27 = int_to_ptr.vmem [resolvable:$true] %s28_s27 }
  0x15   :  { %p297_p9 = scmp.lt.u32.totalorder %s293_s30, %s417_s1 }
  0x17   :  { %p299_p10 = pnand %p297_p9, %p294_p8 }
  0x19   :  { %302 = shalt.err (!%p299_p10)
}
  0x1a   :  { %s303_s8 = scalar_lea.vmem %s29_s27, 512  ;;  %s307_s0 = scalar_lea.vmem %s29_s27, 2048 }
  0x1b   :  { %p304_p11 = scmp.ne.s32.totalorder %s29_s27, %s303_s8  ;;  %p308_p12 = scmp.lt.s32.totalorder %s29_s27, %s29_s27 }
  0x1c   :  { %p309_p13 = scmp.lt.s32.totalorder %s307_s0, %s303_s8 }
  0x1e   :  { %p310_p0 = por %p309_p13, %p308_p12 }
  0x20   :  { %p311_p1 = pnand %p310_p0, %p304_p11 }
  0x22   :  { %314 = shalt.err (!%p311_p1)
}
  0x23   :  { %34 = dma.hbm_to_vmem [thread:$0]  %s417_s1, 512, %s29_s27, [#allocation7], %s344_s22, %s344_s22, %s345_s23  }
  0x24   :  { %337 = dma.done.wait [#allocation4], 256  }
  0x25   :  { %338 = vsyncadd [#allocation4], 4294967040 }
  0x26   :  { %339 = dma.done.wait [#allocation7], 2048  }
  0x27   :  { %340 = vsyncadd [#allocation7], 4294965248  ;;  %v68_v0 = vlaneseq  ;;  %v51_v2 = vld [vmem:[#allocation6] sm:$0xff]  ;;  %v52_v3 = vld [vmem:[#allocation6 + $0x8] sm:$0xff]  ;;  %s347_s12 = smov [#allocation8]  }
  0x28   :  { %v53_v4 = vld [vmem:[#allocation6 + $0x10] sm:$0xff]  ;;  %v258_v5 = vpack.c.bf16 %v52_v3, %v51_v2  ;;  %v54_v6 = vld [vmem:[#allocation6 + $0x18] sm:$0xff]  ;;  %s225_s13 = sshll.u32 %s347_s12, 4  ;;  %s226_s13 = int_to_ptr.vmem [resolvable:$true] %s225_s13 }
  0x29   :  { %v69_v1 = vand.u32 127, %v68_v0  ;;  %v49_v7 = vld [vmem:[#allocation3] sm:$0xff]  ;;  %v262_v8 = vpack.c.bf16 %v54_v6, %v53_v4  ;;  %v50_v9 = vld [vmem:[#allocation3 + $0x8] sm:$0xff]  ;;  %s315_s14 = scalar_lea.vmem %s226_s13, 256  ;;  %p320_p3 = scmp.lt.s32.totalorder %s226_s13, %s226_s13 }
  0x2a   :  { %259 = vmatprep.subr.bf16.mxu0 %v258_v5  ;;  %v240_v10 = vld [vmem:[%s418_s2] ss:$0 sm:$0xff]  ;;  %p316_p2 = scmp.ne.s32.totalorder %s226_s13, %s315_s14  ;;  %p321_p4 = scmp.lt.s32.totalorder %s315_s14, %s315_s14 }
  0x2b   :  { %vm71_vm0 = vcmp.lt.s32.totalorder %v69_v1, 32  ;;  %261 = vmatpush3.bf16.msra.mxu0 %v258_v5 }
  0x2c   :  { %255 = vmatprep.mubr.msk.f32.mxu0 %vm71_vm0, %v49_v7  ;;  %263 = vmatprep.subr.bf16.mxu0 %v262_v8  ;;  %p322_p5 = por %p321_p4, %p320_p3 }
  0x2e   :  { %p323_p6 = pnand %p322_p5, %p316_p2 }
  0x2f   :  { %265 = vmatpush3.bf16.msra.mxu0 %v262_v8 }
  0x32   :  { %256 = vmatmul.mubr.msk.f32.vlgmr.msra.gmra.mrb[0].mxu0 %vm71_vm0, %v50_v9 }
 0x105   :  { %v257_v11 = vpop.f32.mrb[0].mxu0 }
 0x106   :  { %v217_v12 = vadd.f32 %v257_v11, %v240_v10  ;;  %v191_v13 = vpop.f32.mrb[1].mxu0 }
 0x107   :  { %v216_v14 = vadd.f32 %v240_v10, %v191_v13 }
 0x108   :  { %219 = vst [vmem:[#allocation8 + $0x8] sm:$0xff] %v217_v12 }
 0x109   :  { %218 = vst [vmem:[#allocation8] sm:$0xff] %v216_v14 }
 0x10a   :  { %326 = shalt.err (!%p323_p6)
}
 0x10b   :  { %s327_s2 = scalar_lea.hbm %s419_s3, 256 }
 0x10c   :  { %p328_p7 = scmp.ne.s32.totalorder %s419_s3, %s327_s2  ;;  %p331_p8 = scmp.lt.u32.totalorder %s327_s2, %s419_s3 }
 0x10e   :  { %p333_p9 = pnand %p331_p8, %p328_p7 }
 0x110   :  { %336 = shalt.err (!%p333_p9)
}
 0x111   :  { %231 = dma.vmem_to_hbm [thread:$0]  %s226_s13, 256, %s419_s3, [#allocation5], %s344_s22, %s344_s22, %s345_s23  }
 0x112   :  { %341 = dma.done.wait [#allocation5], 256  }
 0x113   :  { %342 = vsyncadd [#allocation5], 4294967040 }
 0x114   :  { %235 = vsyncpa [#allocation4], 1 }
 0x115   :  { %236 = vsyncpa [#allocation7], 1 }
 0x116   :  { %237 = vsyncpa [#allocation5], 1 }

</bundles_post_ra>
